<compile_context>
chip_gen: v7x
topology: tpu7x:2x2x1
jax: 0.10.0
libtpu: 0.0.40
codegen_flags: <defaults>
</compile_context>

<pallas_src>
import functools

import jax
import jax.numpy as jnp
from jax.experimental import pallas as pl
from jax.experimental.pallas import tpu as pltpu

LANE = 512                      # lane-dense last dim of the flattened slab
ACC_ROWS = 8                    # sublane height of the resident accumulator
STRIP_ROWS = 128                # rows per in-kernel accumulation step
BLOCK_BYTES = 4 * 1024 * 1024   # target HBM bytes per operand per grid step
VMEM_LIMIT = 32 * 1024 * 1024   # fits 2 ops x 2 bufs x 4 MiB on v5e/v6e/v7x


def _num_tensorcores():
    """2 on v7x (two TensorCores per chip), else 1.  Detection is best-effort."""
    try:
        kind = jax.devices()[0].device_kind.lower()
    except Exception:
        return 1
    return 2 if "v7" in kind else 1


def _mse_partial_kernel(x_ref, t_ref, acc_ref, *, num_parts, total_blocks,
                        block_rows, strip_rows, num_strips, valid_rows,
                        need_mask, need_skip):
    """Accumulate an (ACC_ROWS, LANE) f32 vector partial of sum((x - t)^2).

    Strip-wise hot loop (pure VPU, fully hidden under the input DMA):
      vld x-strip, vld t-strip, vsub, vmul, vreg-wise adds into the resident
      VMEM accumulator.  No XLU reduce and no scalar RMW per step.
    """
    if num_parts > 1:
        part = pl.program_id(0)
        step = pl.program_id(1)
    else:
        part = 0
        step = pl.program_id(0)

    @pl.when(step == 0)
    def _init():
        acc_ref[...] = jnp.zeros_like(acc_ref)

    # Global row-block handled by this grid point (round-robin over parts).
    blk = step * num_parts + part

    def _accumulate():
        row0 = blk * block_rows
        if need_mask:
            # Hoisted out of the strip loop (JAX does not CSE broadcasts).
            local = jax.lax.broadcasted_iota(jnp.int32, (strip_rows, LANE), 0)

        def strip_body(g, carry):
            r = pl.multiple_of(g * strip_rows, strip_rows)
            xs = x_ref[pl.ds(r, strip_rows), :].astype(jnp.float32)
            ts = t_ref[pl.ds(r, strip_rows), :].astype(jnp.float32)
            d = xs - ts
            dd = d * d
            if need_mask:
                # Rows past `valid_rows` in the final block hold unspecified
                # data (Pallas boundary block) -- zero them before reducing.
                dd = jnp.where(local < (valid_rows - row0 - r), dd, 0.0)
            acc_ref[...] += jnp.sum(
                dd.reshape(strip_rows // ACC_ROWS, ACC_ROWS, LANE), axis=0)
            return carry

        jax.lax.fori_loop(0, num_strips, strip_body, 0,
                          unroll=(num_strips <= 16))

    if need_skip:
        # Round-robin leaves the last step of one core empty when the block
        # count is odd; its input index_map is clamped, so just skip compute.
        pl.when(blk < total_blocks)(_accumulate)
    else:
        _accumulate()


def _mse_forward(x, target):
    assert x.shape == target.shape, "input/target shape mismatch"
    total = int(x.size)

    xf = jnp.ravel(x)
    tf = jnp.ravel(target)

    # ---- static tiling arithmetic -------------------------------------
    chunk = LANE * ACC_ROWS                      # 4096-element alignment unit
    rem = total % chunk
    if rem:
        # Rare fallback: minimal zero-pad (this copies both operands, so it is
        # only taken for badly aligned sizes).  Zero pad on BOTH operands
        # contributes 0 to the squared-diff sum; the mean divides by `total`.
        pad = chunk - rem
        xf = jnp.pad(xf, (0, pad))
        tf = jnp.pad(tf, (0, pad))
    padded_total = total + (chunk - rem if rem else 0)
    rows = padded_total // LANE                  # multiple of ACC_ROWS
    x2 = xf.reshape(rows, LANE)                  # free reshape (no HBM copy)
    t2 = tf.reshape(rows, LANE)

    itemsize = max(jnp.dtype(x.dtype).itemsize, jnp.dtype(target.dtype).itemsize)
    max_block_rows = max(ACC_ROWS, BLOCK_BYTES // (LANE * itemsize))
    block_rows = max_block_rows if rows >= max_block_rows else rows
    strip_rows = next(s for s in (STRIP_ROWS, 64, 32, 16, ACC_ROWS)
                      if block_rows % s == 0)
    num_strips = block_rows // strip_rows
    total_blocks = -(-rows // block_rows)
    need_mask = (rows % block_rows) != 0

    num_parts = min(_num_tensorcores(), total_blocks)
    need_skip = num_parts > 1 and (total_blocks % num_parts) != 0

    if num_parts > 1:
        steps = -(-total_blocks // num_parts)
        grid = (num_parts, steps)
        if need_skip:
            in_idx = lambda p, i: (jnp.minimum(i * num_parts + p,
                                               total_blocks - 1), 0)
        else:
            in_idx = lambda p, i: (i * num_parts + p, 0)
        out_idx = lambda p, i: (p, 0, 0)
        semantics = (pltpu.CORE_PARALLEL, pltpu.ARBITRARY)
    else:
        grid = (total_blocks,)
        in_idx = lambda i: (i, 0)
        out_idx = lambda i: (0, 0, 0)
        semantics = (pltpu.ARBITRARY,)

    kernel = functools.partial(
        _mse_partial_kernel,
        num_parts=num_parts, total_blocks=total_blocks, block_rows=block_rows,
        strip_rows=strip_rows, num_strips=num_strips, valid_rows=rows,
        need_mask=need_mask, need_skip=need_skip)

    partials = pl.pallas_call(
        kernel,
        out_shape=jax.ShapeDtypeStruct((num_parts, ACC_ROWS, LANE), jnp.float32),
        grid_spec=pltpu.PrefetchScalarGridSpec(
            num_scalar_prefetch=0,
            grid=grid,
            in_specs=[
                pl.BlockSpec((block_rows, LANE), in_idx),
                pl.BlockSpec((block_rows, LANE), in_idx),
            ],
            # Per-part partial stays resident in VMEM across the reduction axis.
            out_specs=pl.BlockSpec((None, ACC_ROWS, LANE), out_idx),
        ),
        compiler_params=pltpu.CompilerParams(
            dimension_semantics=semantics,
            vmem_limit_bytes=VMEM_LIMIT,
        ),
        cost_estimate=pl.CostEstimate(
            flops=3 * padded_total,
            transcendentals=0,
            bytes_accessed=2 * padded_total * itemsize
                           + num_parts * ACC_ROWS * LANE * 4),
    )(x2, t2)

    # Single tiny cross-lane reduce + mean (TRUE element count) in the wrapper.
    return jnp.sum(partials) / jnp.float32(total)


@jax.custom_vjp
def mse_loss_pallas(x, target):
    """Mean-squared-error over all elements, computed on TPU via Pallas."""
    return _mse_forward(x, target)


def _mse_fwd(x, target):
    return _mse_forward(x, target), (x, target)


def _mse_bwd(res, g):
    x, target = res
    n = jnp.float32(x.size)
    d = x.astype(jnp.float32) - target.astype(jnp.float32)
    gx = (2.0 * g / n) * d
    return gx.astype(x.dtype), (-gx).astype(target.dtype)


mse_loss_pallas.defvjp(_mse_fwd, _mse_bwd)


class ContentLoss:
    """JAX/Pallas equivalent of the PyTorch ContentLoss module."""

    def __init__(self, target):
        # .detach() in PyTorch: target is a constant w.r.t. autodiff.
        self.target = jax.lax.stop_gradient(target)
        self.loss = None

    def __call__(self, x):
        # Note: storing the loss on the module is fine eagerly; if called
        # under jit, read self.loss inside the traced function (tracer caveat).
        self.loss = mse_loss_pallas(x, self.target)
        return x  # identity pass-through, same as the PyTorch module


if __name__ == "__main__":
    key = jax.random.PRNGKey(0)
    k_in, k_tgt = jax.random.split(key)

    # Small NCHW activation-like shapes: batch=2, channels=4, spatial=16x16.
    x = jax.random.normal(k_in, (2, 4, 16, 16), dtype=jnp.float32)
    target = jax.random.normal(k_tgt, (2, 4, 16, 16), dtype=jnp.float32)

    layer = ContentLoss(target)
    out = layer(x)
    out = jax.block_until_ready(out)
    loss = jax.block_until_ready(layer.loss)

    # Correctness vs. plain-JAX reference (F.mse_loss, mean reduction).
    ref = jnp.mean((x - target) ** 2)
    assert jnp.allclose(loss, ref, rtol=1e-5, atol=1e-6), (loss, ref)
    assert out.shape == x.shape and bool(jnp.all(out == x))

    # Larger shape: copy-free path (size % 4096 == 0), full-width 2048-row block.
    k3, k4 = jax.random.split(k_tgt)
    xb = jax.random.normal(k3, (4, 64, 64, 64), dtype=jnp.float32)
    tb = jax.random.normal(k4, (4, 64, 64, 64), dtype=jnp.float32)
    lb = jax.block_until_ready(mse_loss_pallas(xb, tb))
    refb = jnp.mean((xb - tb) ** 2)
    assert jnp.allclose(lb, refb, rtol=1e-4, atol=1e-6), (lb, refb)

    # Ragged last block: 2056 rows -> one full 2048-row block + masked tail block.
    k5, k6 = jax.random.split(k4)
    xm = jax.random.normal(k5, (2056, 512), dtype=jnp.float32)
    tm = jax.random.normal(k6, (2056, 512), dtype=jnp.float32)
    lm = jax.block_until_ready(mse_loss_pallas(xm, tm))
    refm = jnp.mean((xm - tm) ** 2)
    assert jnp.allclose(lm, refm, rtol=1e-4, atol=1e-6), (lm, refm)

    # bf16 activations stay bf16 on the wire (kernel upcasts per strip).
    xh = xb.astype(jnp.bfloat16)
    th = tb.astype(jnp.bfloat16)
    lh = jax.block_until_ready(mse_loss_pallas(xh, th))
    refh = jnp.mean((xh.astype(jnp.float32) - th.astype(jnp.float32)) ** 2)
    assert jnp.allclose(lh, refh, rtol=1e-4, atol=1e-6), (lh, refh)

    # Gradient path (custom VJP): d(loss)/dx == 2*(x - target)/N.
    gx = jax.grad(lambda a: mse_loss_pallas(a, target))(x)
    gref = 2.0 * (x - target) / x.size
    assert jnp.allclose(jax.block_until_ready(gx), gref, rtol=1e-5, atol=1e-6)

    print("KERNEL_OK")
</pallas_src>

<mosaic_0001>
module attributes {stable_mosaic.version = 11 : i64} {
  func.func @_mse_partial_kernel(%arg0: i32, %arg1: memref<8x512xf32, #tpu.memory_space<vmem>>, %arg2: memref<8x512xf32, #tpu.memory_space<vmem>>, %arg3: memref<1x8x512xf32, #tpu.memory_space<vmem>>) attributes {dimension_semantics = [#tpu.dimension_semantics<arbitrary>], iteration_bounds = array<i64: 1>, scalar_prefetch = 0 : i64, scratch_operands = 0 : i64, tpu.core_type = #tpu.core_type<tc>, window_params = [{transform_indices = @transform_0, window_bounds = array<i64: 8, 512>}, {transform_indices = @transform_1, window_bounds = array<i64: 8, 512>}, {pipeline_mode = #tpu.pipeline_mode<synchronous>, transform_indices = @transform_2, window_bounds = array<i64: 1, 8, 512>}]} {
    %c0_i32 = arith.constant 0 : i32
    %0 = arith.cmpi eq, %arg0, %c0_i32 : i32
    %1 = arith.extui %0 : i1 to i32
    %c0_i32_0 = arith.constant 0 : i32
    %2 = arith.cmpi ne, %1, %c0_i32_0 : i32
    scf.if %2 {
      %cst_9 = arith.constant 0.000000e+00 : f32
      %19 = vector.broadcast %cst_9 : f32 to vector<8x512xf32>
      %c0_10 = arith.constant 0 : index
      %c0_11 = arith.constant 0 : index
      %c0_12 = arith.constant 0 : index
      %20 = vector.load %arg3[%c0_10, %c0_11, %c0_12] : memref<1x8x512xf32, #tpu.memory_space<vmem>>, vector<1x8x512xf32>
      %21 = vector.shape_cast %20 : vector<1x8x512xf32> to vector<8x512xf32>
      %22 = vector.shape_cast %19 : vector<8x512xf32> to vector<1x8x512xf32>
      tpu.vector_store %arg3[%c0_10, %c0_11, %c0_12], %22 {strides = array<i32>} : memref<1x8x512xf32, #tpu.memory_space<vmem>>, vector<1x8x512xf32>,
    } else {
    }
    %c0_i32_1 = arith.constant 0 : i32
    %c8_i32 = arith.constant 8 : i32
    %3 = arith.muli %c0_i32_1, %c8_i32 : i32
    %4 = tpu.assume_multiple %3, 8 : i32
    %5 = arith.index_cast %4 : i32 to index
    %c0 = arith.constant 0 : index
    %6 = vector.load %arg1[%5, %c0] : memref<8x512xf32, #tpu.memory_space<vmem>>, vector<8x512xf32>
    %7 = arith.index_cast %4 : i32 to index
    %c0_2 = arith.constant 0 : index
    %8 = vector.load %arg2[%7, %c0_2] : memref<8x512xf32, #tpu.memory_space<vmem>>, vector<8x512xf32>
    %9 = arith.subf %6, %8 : vector<8x512xf32>
    %10 = arith.mulf %9, %9 : vector<8x512xf32>
    %c0_3 = arith.constant 0 : index
    %c0_4 = arith.constant 0 : index
    %c0_5 = arith.constant 0 : index
    %11 = vector.load %arg3[%c0_3, %c0_4, %c0_5] : memref<1x8x512xf32, #tpu.memory_space<vmem>>, vector<1x8x512xf32>
    %12 = vector.shape_cast %11 : vector<1x8x512xf32> to vector<8x512xf32>
    %13 = vector.shape_cast %10 : vector<8x512xf32> to vector<1x8x512xf32>
    %cst = arith.constant dense<0.000000e+00> : vector<8x512xf32>
    %14 = vector.multi_reduction <add>, %13, %cst [0] : vector<1x8x512xf32> to vector<8x512xf32>
    %15 = arith.addf %12, %14 : vector<8x512xf32>
    %c0_6 = arith.constant 0 : index
    %c0_7 = arith.constant 0 : index
    %c0_8 = arith.constant 0 : index
    %16 = vector.load %arg3[%c0_6, %c0_7, %c0_8] : memref<1x8x512xf32, #tpu.memory_space<vmem>>, vector<1x8x512xf32>
    %17 = vector.shape_cast %16 : vector<1x8x512xf32> to vector<8x512xf32>
    %18 = vector.shape_cast %15 : vector<8x512xf32> to vector<1x8x512xf32>
    tpu.vector_store %arg3[%c0_6, %c0_7, %c0_8], %18 {strides = array<i32>} : memref<1x8x512xf32, #tpu.memory_space<vmem>>, vector<1x8x512xf32>,
    %c1_i32 = arith.constant 1 : i32
    return
  }
  func.func @transform_0(%arg0: i32) -> (i32, i32) {
    %c0_i32 = arith.constant 0 : i32
    %c0_i32_0 = arith.constant 0 : i32
    return %arg0, %c0_i32 : i32, i32
  }
  func.func @transform_1(%arg0: i32) -> (i32, i32) {
    %c0_i32 = arith.constant 0 : i32
    %c0_i32_0 = arith.constant 0 : i32
    return %arg0, %c0_i32 : i32, i32
  }
  func.func @transform_2(%arg0: i32) -> (i32, i32, i32) {
    %c0_i32 = arith.constant 0 : i32
    %c0_i32_0 = arith.constant 0 : i32
    %c0_i32_1 = arith.constant 0 : i32
    %c0_i32_2 = arith.constant 0 : i32
    return %c0_i32, %c0_i32_0, %c0_i32_1 : i32, i32, i32
  }
}

</mosaic_0001>

<bundles_post_ra>
// kernel: tpu_custom_call.1
= control target key start
LH: loop header
LB: loop body
LE: loop exit
PB: predicated region body
PF: predicated region fallthrough
CT: control target
= control target key end

     0   :  { %7 = vsyncpa [#allocation3], 0  ;;  %s227_s0 = inlined_call_operand.hbm [shape: f32[8,512], index: 0, kind: input, shape index: {}]   ;;  %s228_s1 = inlined_call_operand.hbm [shape: f32[8,512], index: 1, kind: input, shape index: {}]   ;;  %s229_s2 = inlined_call_operand.hbm [shape: f32[1,8,512], index: 2, kind: output, shape index: {}]  }
   0x1   :  { %8 = vsyncpa [#allocation6], 0 }
   0x2   :  { %9 = vsyncpa [#allocation4], 0  ;;  %s173_s9 = smov [#allocation2]   ;;  %s174_s11 = smov [#allocation5]  }
   0x3   :  { %s16_s10 = sshll.u32 %s173_s9, 4  ;;  %s26_s12 = sshll.u32 %s174_s11, 4  ;;  %s17_s10 = int_to_ptr.vmem [resolvable:$true] %s16_s10  ;;  %s27_s12 = int_to_ptr.vmem [resolvable:$true] %s26_s12 }
   0x4   :  { %s101_s15 = scalar_lea.hbm %s227_s0, 512 }
   0x5   :  { %p102_p0 = scmp.ne.s32.totalorder %s227_s0, %s101_s15  ;;  %p105_p1 = scmp.lt.u32.totalorder %s101_s15, %s227_s0 }
   0x7   :  { %p107_p2 = pnand %p105_p1, %p102_p0 }
   0x9   :  { %110 = shalt.err (!%p107_p2)
}
   0xa   :  { %s111_s20 = scalar_lea.vmem %s17_s10, 512  ;;  %p116_p4 = scmp.lt.s32.totalorder %s17_s10, %s17_s10 }
   0xb   :  { %p112_p3 = scmp.ne.s32.totalorder %s17_s10, %s111_s20  ;;  %p117_p5 = scmp.lt.s32.totalorder %s111_s20, %s111_s20 }
   0xd   :  { %p118_p6 = por %p117_p5, %p116_p4 }
   0xf   :  { %p119_p7 = pnand %p118_p6, %p112_p3 }
  0x11   :  { %122 = shalt.err (!%p119_p7)
}
  0x12   :  { %19 = dma.hbm_to_vmem [thread:$0]  %s227_s0, 512, %s17_s10, [#allocation3]  }
  0x13   :  { %s123_s25 = scalar_lea.hbm %s228_s1, 512 }
  0x14   :  { %p124_p8 = scmp.ne.s32.totalorder %s228_s1, %s123_s25  ;;  %p127_p9 = scmp.lt.u32.totalorder %s123_s25, %s228_s1 }
  0x16   :  { %p129_p10 = pnand %p127_p9, %p124_p8 }
  0x18   :  { %132 = shalt.err (!%p129_p10)
}
  0x19   :  { %s133_s30 = scalar_lea.vmem %s27_s12, 512  ;;  %p138_p12 = scmp.lt.s32.totalorder %s27_s12, %s27_s12 }
  0x1a   :  { %p134_p11 = scmp.ne.s32.totalorder %s27_s12, %s133_s30  ;;  %p139_p13 = scmp.lt.s32.totalorder %s133_s30, %s133_s30 }
  0x1c   :  { %p140_p0 = por %p139_p13, %p138_p12 }
  0x1e   :  { %p141_p1 = pnand %p140_p0, %p134_p11 }
  0x20   :  { %144 = shalt.err (!%p141_p1)
}
  0x21   :  { %29 = dma.hbm_to_vmem [thread:$0]  %s228_s1, 512, %s27_s12, [#allocation6]  }
  0x22   :  { %167 = dma.done.wait [#allocation3], 512  }
  0x23   :  { %168 = vsyncadd [#allocation3], 4294966784 }
  0x24   :  { %169 = dma.done.wait [#allocation6], 512  }
  0x25   :  { %170 = vsyncadd [#allocation6], 4294966784  ;;  %v47_v0 = vld [vmem:[#allocation2] sm:$0xff]  ;;  %v48_v2 = vld [vmem:[#allocation2 + $0x8] sm:$0xff]  ;;  %s175_s1 = smov [#allocation7]  }
  0x26   :  { %v53_v1 = vld [vmem:[#allocation5] sm:$0xff]  ;;  %v54_v4 = vld [vmem:[#allocation5 + $0x8] sm:$0xff]  ;;  %v49_v5 = vld [vmem:[#allocation2 + $0x10] sm:$0xff]  ;;  %s87_s4 = sshll.u32 %s175_s1, 4  ;;  %s88_s4 = int_to_ptr.vmem [resolvable:$true] %s87_s4 }
  0x27   :  { %v57_v3 = vsub.f32 %v47_v0, %v53_v1  ;;  %v55_v6 = vld [vmem:[#allocation5 + $0x10] sm:$0xff]  ;;  %v58_v7 = vsub.f32 %v48_v2, %v54_v4  ;;  %v50_v9 = vld [vmem:[#allocation2 + $0x18] sm:$0xff]  ;;  %s145_s5 = scalar_lea.vmem %s88_s4, 512  ;;  %p150_p3 = scmp.lt.s32.totalorder %s88_s4, %s88_s4 }
  0x28   :  { %v59_v8 = vsub.f32 %v49_v5, %v55_v6  ;;  %v56_v10 = vld [vmem:[#allocation5 + $0x18] sm:$0xff]  ;;  %p146_p2 = scmp.ne.s32.totalorder %s88_s4, %s145_s5  ;;  %p151_p4 = scmp.lt.s32.totalorder %s145_s5, %s145_s5 }
  0x29   :  { %v61_v11 = vmul.f32 %v57_v3, %v57_v3  ;;  %v60_v12 = vsub.f32 %v50_v9, %v56_v10  ;;  %v62_v13 = vmul.f32 %v58_v7, %v58_v7 }
  0x2a   :  { %v63_v14 = vmul.f32 %v59_v8, %v59_v8  ;;  %p152_p5 = por %p151_p4, %p150_p3 }
  0x2b   :  { %v64_v15 = vmul.f32 %v60_v12, %v60_v12  ;;  %77 = vst [vmem:[#allocation7] sm:$0xff] %v61_v11  ;;  %78 = vst [vmem:[#allocation7 + $0x8] sm:$0xff] %v62_v13 }
  0x2c   :  { %79 = vst [vmem:[#allocation7 + $0x10] sm:$0xff] %v63_v14  ;;  %p153_p6 = pnand %p152_p5, %p146_p2 }
  0x2d   :  { %80 = vst [vmem:[#allocation7 + $0x18] sm:$0xff] %v64_v15 }
  0x2e   :  { %156 = shalt.err (!%p153_p6)
}
  0x2f   :  { %s157_s8 = scalar_lea.hbm %s229_s2, 512 }
  0x30   :  { %p158_p7 = scmp.ne.s32.totalorder %s229_s2, %s157_s8  ;;  %p161_p8 = scmp.lt.u32.totalorder %s157_s8, %s229_s2 }
  0x32   :  { %p163_p9 = pnand %p161_p8, %p158_p7 }
  0x34   :  { %166 = shalt.err (!%p163_p9)
}
  0x35   :  { %90 = dma.vmem_to_hbm [thread:$0]  %s88_s4, 512, %s229_s2, [#allocation4]  }
  0x36   :  { %171 = dma.done.wait [#allocation4], 512  }
  0x37   :  { %172 = vsyncadd [#allocation4], 4294966784 }
  0x38   :  { %94 = vsyncpa [#allocation3], 1 }
  0x39   :  { %95 = vsyncpa [#allocation6], 1 }
  0x3a   :  { %96 = vsyncpa [#allocation4], 1 }

</bundles_post_ra>
